<compile_context>
chip_gen: v7x
topology: tpu7x:2x2x1
jax: 0.10.0
libtpu: 0.0.40
codegen_flags: <defaults>
</compile_context>

<pallas_src>
import functools

import jax
import jax.numpy as jnp
from jax import lax
from jax.experimental import pallas as pl
from jax.experimental.pallas import tpu as pltpu


def _round_up(a, b):
    return (a + b - 1) // b * b


def _clarinet_conv_kernel(x_ref, w_ref, b_ref, o_ref, *, K, Cin, dilation, TL):
    # x_ref : (Cin, L_in_total)  whole padded input sequence, one batch element
    # w_ref : (Cout, K*Cin)      weight-normalized weight, taps stacked along columns
    # b_ref : (Cout, 1)          bias (f32)
    # o_ref : (Cout, TL)         lane-dense output tile (L in the lane dim)
    halo = dilation * (K - 1)
    lt = pl.program_id(1)
    base = pl.multiple_of(lt * TL, TL)            # TL is a multiple of 128 -> aligned start
    window = x_ref[:, pl.ds(base, TL + halo)]     # (Cin, TL + halo), one aligned load

    # Fuse the K taps: stack dilation-shifted slices along the channel axis so the whole
    # receptive field is one matmul with contraction depth K*Cin.
    xk = jnp.concatenate(
        [window[:, k * dilation:k * dilation + TL] for k in range(K)], axis=0
    )                                             # (K*Cin, TL)

    acc = jnp.dot(w_ref[...], xk, preferred_element_type=jnp.float32)   # (Cout, TL) f32
    o_ref[...] = (acc + b_ref[...]).astype(o_ref.dtype)                 # bias added once


def clarinet_conv(x, weight_v, weight_g, bias, *, kernel_size, dilation=1,
                  causal=False, mode="SAME", compute_dtype=jnp.bfloat16):
    """x: (N, C_in, L) float32 (PyTorch NCL).  Returns (N, C_out, L_out) float32."""
    N, Cin, L = x.shape
    Cout, Cin2, K = weight_v.shape
    assert Cin2 == Cin and K == kernel_size

    halo = dilation * (K - 1)
    if causal and mode == "SAME":
        # Left-only padding is mathematically identical to pad-both-sides + tail trim,
        # but computes no dead output rows.
        pad_l, pad_r = halo, 0
    elif mode == "SAME":
        pad_l = pad_r = halo // 2
    else:
        pad_l = pad_r = 0
    L_out = L + pad_l + pad_r - halo
    assert L_out > 0

    # Lane tile along L (multiple of 128); pad the output length up to a whole tile.
    TL = min(512, _round_up(L_out, 128))
    n_lt = pl.cdiv(L_out, TL)
    L_out_padded = n_lt * TL
    L_in_total = L_out_padded + halo

    # ---- hoisted weight_norm (PyTorch weight_norm, dim=0) + parameter packing ----
    v32 = weight_v.astype(jnp.float32)
    # NOTE: like PyTorch, no epsilon -> an all-zero output channel in weight_v gives NaN/Inf.
    norm = jnp.sqrt(jnp.sum(v32 * v32, axis=(1, 2), keepdims=True))          # (Cout,1,1)
    w = weight_g.reshape(Cout, 1, 1).astype(jnp.float32) * v32 / norm        # (Cout,Cin,K)
    w2 = w.transpose(0, 2, 1).reshape(Cout, K * Cin).astype(compute_dtype)   # [o, k*Cin + c]
    b2 = bias.reshape(Cout, 1).astype(jnp.float32)

    # Pad input: conv padding on the left, conv padding + tile rounding on the right.
    pad_right_total = L_in_total - pad_l - L
    x_pad = jnp.pad(x, ((0, 0), (0, 0), (pad_l, pad_right_total))).astype(compute_dtype)

    kernel = functools.partial(_clarinet_conv_kernel,
                               K=K, Cin=Cin, dilation=dilation, TL=TL)

    itemsize = jnp.dtype(compute_dtype).itemsize
    vmem_need = (2 * Cin * L_in_total * itemsize       # double-buffered x block
                 + 2 * Cout * TL * 4                   # double-buffered output block
                 + Cout * K * Cin * itemsize + Cout * 4)
    vmem_limit = int(min(max(2 * vmem_need, 32 * 1024 * 1024), 100 * 1024 * 1024))

    out = pl.pallas_call(
        kernel,
        out_shape=jax.ShapeDtypeStruct((N, Cout, L_out_padded), jnp.float32),
        grid_spec=pltpu.PrefetchScalarGridSpec(
            num_scalar_prefetch=0,
            grid=(N, n_lt),
            in_specs=[
                pl.BlockSpec((None, Cin, L_in_total), lambda n, lt: (n, 0, 0)),
                pl.BlockSpec((Cout, K * Cin), lambda n, lt: (0, 0)),
                pl.BlockSpec((Cout, 1), lambda n, lt: (0, 0)),
            ],
            out_specs=pl.BlockSpec((None, Cout, TL), lambda n, lt: (n, 0, lt)),
        ),
        compiler_params=pltpu.CompilerParams(
            dimension_semantics=("parallel", "parallel"),
            vmem_limit_bytes=vmem_limit),
    )(x_pad, w2, b2)

    return out[:, :, :L_out]                           # drop the tile-rounding padding


def _reference(x, weight_v, weight_g, bias, *, kernel_size, dilation, causal, mode):
    """Pure-JAX reference reproducing the PyTorch forward exactly."""
    Cout = weight_v.shape[0]
    if causal and mode == "SAME":
        pad = dilation * (kernel_size - 1)
    elif mode == "SAME":
        pad = dilation * (kernel_size - 1) // 2
    else:
        pad = 0
    norm = jnp.sqrt(jnp.sum(weight_v * weight_v, axis=(1, 2), keepdims=True))
    w = weight_g.reshape(Cout, 1, 1) * weight_v / norm
    out = lax.conv_general_dilated(
        x, w, window_strides=(1,), padding=[(pad, pad)],
        rhs_dilation=(dilation,),
        dimension_numbers=("NCH", "OIH", "NCH"))
    out = out + bias.reshape(1, Cout, 1)
    if causal and pad != 0:
        out = out[:, :, :-pad]
    return out


if __name__ == "__main__":
    # Small, deterministic setup consistent with the module's __init__.
    N, Cin, Cout, L = 2, 4, 8, 16
    kernel_size, dilation, causal, mode = 3, 2, True, "SAME"

    key = jax.random.PRNGKey(0)
    k1, k2, k3, k4 = jax.random.split(key, 4)
    x = jax.random.normal(k1, (N, Cin, L), dtype=jnp.float32)
    weight_v = jax.random.normal(k2, (Cout, Cin, kernel_size), dtype=jnp.float32)
    weight_g = 0.5 + jax.random.uniform(k3, (Cout,), dtype=jnp.float32)
    bias = 0.1 * jax.random.normal(k4, (Cout,), dtype=jnp.float32)

    # Causal path, f32 operands: tight tolerance.
    ref = _reference(x, weight_v, weight_g, bias, kernel_size=kernel_size,
                     dilation=dilation, causal=causal, mode=mode)
    out_f32 = jax.block_until_ready(clarinet_conv(
        x, weight_v, weight_g, bias, kernel_size=kernel_size, dilation=dilation,
        causal=causal, mode=mode, compute_dtype=jnp.float32))
    assert out_f32.shape == ref.shape, (out_f32.shape, ref.shape)
    assert jnp.allclose(out_f32, ref, atol=1e-4, rtol=1e-4)

    # Same path with bf16 matmul operands (f32 accumulation): loose tolerance.
    out_bf16 = jax.block_until_ready(clarinet_conv(
        x, weight_v, weight_g, bias, kernel_size=kernel_size, dilation=dilation,
        causal=causal, mode=mode, compute_dtype=jnp.bfloat16))
    assert out_bf16.shape == ref.shape
    assert jnp.allclose(out_bf16, ref, atol=5e-2, rtol=5e-2)

    # Non-causal SAME path (other padding branch), f32 operands.
    ref_nc = _reference(x, weight_v, weight_g, bias, kernel_size=kernel_size,
                        dilation=dilation, causal=False, mode=mode)
    out_nc = jax.block_until_ready(clarinet_conv(
        x, weight_v, weight_g, bias, kernel_size=kernel_size, dilation=dilation,
        causal=False, mode=mode, compute_dtype=jnp.float32))
    assert out_nc.shape == ref_nc.shape, (out_nc.shape, ref_nc.shape)
    assert jnp.allclose(out_nc, ref_nc, atol=1e-4, rtol=1e-4)

    print("KERNEL_OK")
</pallas_src>

<mosaic_0001>
module attributes {stable_mosaic.version = 11 : i64} {
  func.func @_clarinet_conv_kernel(%arg0: i32, %arg1: i32, %arg2: memref<1x4x132xf32, #tpu.memory_space<vmem>>, %arg3: memref<8x12xf32, #tpu.memory_space<vmem>>, %arg4: memref<8x1xf32, #tpu.memory_space<vmem>>, %arg5: memref<1x8x128xf32, #tpu.memory_space<vmem>>) attributes {dimension_semantics = [#tpu.dimension_semantics<parallel>, #tpu.dimension_semantics<parallel>], iteration_bounds = array<i64: 2, 1>, scalar_prefetch = 0 : i64, scratch_operands = 0 : i64, tpu.core_type = #tpu.core_type<tc>, window_params = [{transform_indices = @transform_0, window_bounds = array<i64: 1, 4, 132>}, {pipeline_mode = #tpu.pipeline_mode<synchronous>, transform_indices = @transform_1, window_bounds = array<i64: 8, 12>}, {pipeline_mode = #tpu.pipeline_mode<synchronous>, transform_indices = @transform_2, window_bounds = array<i64: 8, 1>}, {transform_indices = @transform_3, window_bounds = array<i64: 1, 8, 128>}]} {
    %c128_i32 = arith.constant 128 : i32
    %0 = arith.muli %arg1, %c128_i32 : i32
    %1 = tpu.assume_multiple %0, 128 : i32
    %c0 = arith.constant 0 : index
    %c0_0 = arith.constant 0 : index
    %2 = arith.index_cast %1 : i32 to index
    %3 = vector.load %arg2[%c0, %c0_0, %2] : memref<1x4x132xf32, #tpu.memory_space<vmem>>, vector<1x4x132xf32>
    %4 = vector.shape_cast %3 : vector<1x4x132xf32> to vector<4x132xf32>
    %5 = vector.extract_strided_slice %4 {offsets = [0, 0], sizes = [4, 128], strides = [1, 1]} : vector<4x132xf32> to vector<4x128xf32>
    %6 = vector.extract_strided_slice %4 {offsets = [0, 2], sizes = [4, 128], strides = [1, 1]} : vector<4x132xf32> to vector<4x128xf32>
    %7 = vector.extract_strided_slice %4 {offsets = [0, 4], sizes = [4, 128], strides = [1, 1]} : vector<4x132xf32> to vector<4x128xf32>
    %8 = tpu.concatenate %5, %6, %7 in 0 : vector<4x128xf32>, vector<4x128xf32>, vector<4x128xf32> -> vector<12x128xf32>
    %c0_1 = arith.constant 0 : index
    %c0_2 = arith.constant 0 : index
    %9 = vector.load %arg3[%c0_1, %c0_2] : memref<8x12xf32, #tpu.memory_space<vmem>>, vector<8x12xf32>
    %cst = arith.constant dense<0.000000e+00> : vector<8x128xf32>
    %10 = tpu.matmul %9, %8, %cst {dimension_numbers = #tpu.dot_dimension_numbers<[1], [0], [0], [1], [0, 0, 1, 1], [], []>} : vector<8x12xf32>, vector<12x128xf32>, vector<8x128xf32> -> vector<8x128xf32>
    %c0_3 = arith.constant 0 : index
    %c0_4 = arith.constant 0 : index
    %11 = vector.load %arg4[%c0_3, %c0_4] : memref<8x1xf32, #tpu.memory_space<vmem>>, vector<8x1xf32>
    %12 = vector.broadcast %11 : vector<8x1xf32> to vector<8x128xf32>
    %13 = arith.addf %10, %12 : vector<8x128xf32>
    %c0_5 = arith.constant 0 : index
    %c0_6 = arith.constant 0 : index
    %c0_7 = arith.constant 0 : index
    %14 = vector.load %arg5[%c0_5, %c0_6, %c0_7] : memref<1x8x128xf32, #tpu.memory_space<vmem>>, vector<1x8x128xf32>
    %15 = vector.shape_cast %14 : vector<1x8x128xf32> to vector<8x128xf32>
    %16 = vector.shape_cast %13 : vector<8x128xf32> to vector<1x8x128xf32>
    tpu.vector_store %arg5[%c0_5, %c0_6, %c0_7], %16 {strides = array<i32>} : memref<1x8x128xf32, #tpu.memory_space<vmem>>, vector<1x8x128xf32>,
    return
  }
  func.func @transform_0(%arg0: i32, %arg1: i32) -> (i32, i32, i32) {
    %c0_i32 = arith.constant 0 : i32
    %c0_i32_0 = arith.constant 0 : i32
    %c0_i32_1 = arith.constant 0 : i32
    return %arg0, %c0_i32, %c0_i32_0 : i32, i32, i32
  }
  func.func @transform_1(%arg0: i32, %arg1: i32) -> (i32, i32) {
    %c0_i32 = arith.constant 0 : i32
    %c0_i32_0 = arith.constant 0 : i32
    %c0_i32_1 = arith.constant 0 : i32
    return %c0_i32, %c0_i32_0 : i32, i32
  }
  func.func @transform_2(%arg0: i32, %arg1: i32) -> (i32, i32) {
    %c0_i32 = arith.constant 0 : i32
    %c0_i32_0 = arith.constant 0 : i32
    %c0_i32_1 = arith.constant 0 : i32
    return %c0_i32, %c0_i32_0 : i32, i32
  }
  func.func @transform_3(%arg0: i32, %arg1: i32) -> (i32, i32, i32) {
    %c0_i32 = arith.constant 0 : i32
    %c0_i32_0 = arith.constant 0 : i32
    return %arg0, %c0_i32, %arg1 : i32, i32, i32
  }
}

</mosaic_0001>

<bundles_post_ra>
// kernel: tpu_custom_call.1
= control target key start
LH: loop header
LB: loop body
LE: loop exit
PB: predicated region body
PF: predicated region fallthrough
CT: control target
= control target key end

     0   :  { %8 = vsyncpa [#allocation3], 0  ;;  %s844_s0 = inlined_call_operand.hbm [shape: f32[2,4,132], index: 0, kind: input, shape index: {}]   ;;  %s845_s1 = inlined_call_operand.vmem [shape: f32[8,12], index: 1, kind: input, shape index: {}]   ;;  %s846_s2 = inlined_call_operand.vmem [shape: f32[8,1], index: 2, kind: input, shape index: {}]   ;;  %s847_s3 = inlined_call_operand.hbm [shape: f32[2,8,128], index: 3, kind: output, shape index: {}]  }
   0x1   :  { %10 = vsyncpa [#allocation3 + $0x1], 0 }
   0x2   :  { %11 = vsyncpa [#allocation4], 0 }
   0x3   :  { %13 = vsyncpa [#allocation4 + $0x1], 0  ;;  %s662_s12 = smov 0   ;;  %s664_s13 = smov 0  }
   0x4   :  { %s666_s14 = smov 0   ;;  %s668_s15 = smov 0  }
   0x5   :  { %s670_s16 = smov 0   ;;  %s672_s17 = smov 0  }
   0x6 LB: > { %s405_s18 = sadd.s32 4294967295, %s631_s17   ;;  %s406_s19 = sadd.s32 4294967294, %s631_s17   ;;  %s631_s17 = sphi %s672_s17, %s19_s17   ;;  %s627_s16 = sphi %s670_s16, %s863_s16   ;;  %s623_s15 = sphi %s668_s15, %s862_s15   ;;  %s619_s14 = sphi %s666_s14, %s861_s14   ;;  %s615_s13 = sphi %s664_s13, %s860_s13   ;;  %s611_s12 = sphi %s662_s12, %s859_s12  }
   0x7   : > { %s31_s20 = sadd.s32 1, %s627_s16  ;;  %s38_s21 = sadd.s32 1, %s619_s14 }
   0x8   : > { %p33_p0 = scmp.ge.s32.totalorder %s31_s20, 2  ;;  %p45_p1 = scmp.ne.s32.totalorder %s619_s14, %s615_s13 }
   0x9   : > { %p46_p2 = scmp.eq.s32.totalorder %s631_s17, 0  ;;  %p51_p3 = scmp.ne.s32.totalorder %s615_s13, %s611_s12 }
   0xa   : > { %s865_s20 = smov (%p33_p0, %s31_s20), 0  ;;  %p52_p5 = scmp.eq.s32.totalorder %s405_s18, 0 }
   0xb   : > { %p703_p4 = por %p46_p2, %p45_p1  ;;  %s35_s23 = ssub.s32 %s627_s16, %s865_s20 }
   0xc   : > { %p119_p6 = scmp.eq.s32.totalorder %s405_s18, 1  ;;  %p36_p7 = scmp.eq.s32.totalorder %s35_s23, 0 }
   0xd   : > { %p709_p8 = por %p52_p5, %p51_p3  ;;  %p125_p10 = scmp.eq.s32.totalorder %s406_s19, 1 }
   0xe   : > { %p713_p9 = por %p119_p6, %p45_p1  ;;  %p448_p13 = scmp.lt.s32.totalorder %s631_s17, 2 }
   0xf   : > { %s718_s26 = scalar_select %p36_p7, %s619_s14, %s38_s21  }
  0x10   : > { %s851_s25 = scalar_select %p713_p9, 1, 0 }
  0x11   : > { %p720_p11 = por %p125_p10, %p51_p3  ;;  %s151_s28 = sand.u32 1, %s619_s14  }
  0x12   : > { %s409_s29 = sshll.u32 %s151_s28, 3  ;;  %s421_s30 = sshll.u32 %s627_s16, 7 }
  0x13   : > { %s852_s27 = scalar_select %p720_p11, 1, 0 }
  0x14   : > { %s731_s6 = scalar_lea.hbm %s844_s0, %s421_s30  ;;  %s155_s7 = scalar_lea.vmem [#allocation2], %s409_s29 }
  0x15   : > { %s163_s8 = sshll.u32 %s155_s7, 4  ;;  %p737_p0 = pnand %p448_p13, %p703_p4  ;;  %s733_s8 = int_to_ptr.vmem [resolvable:$true] %s163_s8 }
  0x16   : > { %s152_s10 = scalar_lea.sflag [#allocation3], %s151_s28  ;;  %s519_s11 = scalar_lea.hbm %s731_s6, 128 }
  0x17   : > { %p520_p3 = scmp.ne.s32.totalorder %s731_s6, %s519_s11  ;;  %p521_p5 = pneg %p737_p0 }
  0x18   : > { %s524_s21 = scalar_lea.hbm %s844_s0, 256  ;;  %p525_p4 = scmp.lt.u32.totalorder %s731_s6, %s844_s0 }
  0x19   : > { %p522_p6 = pnand %p521_p5, %p520_p3  ;;  %p526_p10 = scmp.lt.u32.totalorder %s524_s21, %s519_s11 }
  0x1a   : > { %p528_p12 = scmp.lt.u32.totalorder %s519_s11, %s731_s6 }
  0x1b   : > { %p523_p7 = pneg %p522_p6  ;;  %p527_p13 = por %p526_p10, %p525_p4 }
  0x1d   : > { %p529_p1 = por %p528_p12, %p527_p13 }
  0x1f   : > { %p530_p2 = pnand %p529_p1, %p523_p7 }
  0x21   : > { %533 = shalt.err (!%p530_p2)
}
  0x22   : > { %s534_s28 = scalar_lea.vmem %s733_s8, 128  ;;  %s633_s29 = smov [#allocation2]  }
  0x23   : > { %p535_p3 = scmp.ne.s32.totalorder %s733_s8, %s534_s28  ;;  %s539_s30 = sshll.u32 %s633_s29, 4  ;;  %s540_s30 = int_to_ptr.vmem [resolvable:$false] %s539_s30 }
  0x24   : > { %s541_s4 = scalar_lea.vmem %s540_s30, 256  ;;  %p542_p9 = scmp.lt.s32.totalorder %s733_s8, %s540_s30 }
  0x25   : > { %p537_p6 = pnand %p535_p3, %p521_p5  ;;  %p543_p4 = scmp.lt.s32.totalorder %s541_s4, %s534_s28 }
  0x27   : > { %p538_p11 = pneg %p537_p6  ;;  %p544_p10 = por %p543_p4, %p542_p9 }
  0x29   : > { %p545_p12 = pnand %p544_p10, %p538_p11 }
  0x2b   : > { %548 = shalt.err (!%p545_p12)
}
  0x2c   : > { %443 = dma.hbm_to_vmem [thread:$0]  (!%p737_p0), %s731_s6, 128, %s733_s8, %s152_s10  }
  0x2d   : > { %p854_p1 = scmp.lt.s32.totalorder %s631_s17, 3  ;;  %p855_p2 = scmp.ge.s32.totalorder %s631_s17, 1 }
  0x2f   : > { %p169_p5 = pnand %p855_p2, %p854_p1 }
  0x30   : > { %s773_s5 = sand.u32 (!%p169_p5), 1, %s615_s13  }
  0x31   : > { %172 = sbr.rel (%p169_p5) target bundleno = 417 (0x1a1), region = 32  ;;  %s413_s7 = sshll.u32 (!%p169_p5), %s773_s5, 3 }
  0x32   : > { %s175_s11 = scalar_lea.sflag (!%p169_p5), [#allocation3], %s773_s5  ;;  %s178_s9 = scalar_lea.vmem (!%p169_p5), [#allocation2], %s413_s7 }
  0x38   : > { %602 = dma.done.wait (%p709_p8), %s175_s11, 128  }
  0x39   : > { %604 = vsyncadd (%p709_p8), %s175_s11, 4294967168  ;;  %v634_v0 = vmov 0.0|0.0   ;;  %v206_v1 = vld [vmem:[%s178_s9] sm:$0xff]  ;;  %vm635_vm0 = vmmov 0   ;;  %v636_v4 = vmov 0.0   ;;  %s637_s10 = smov 126  }
  0x3a   : > { %432 = vmatprep.subr.bf16.mxu0 %v634_v0  ;;  %v208_v2 = vcombine.low %v206_v1, %v206_v1  ;;  %v216_v3 = vcombine.high %v206_v1, %v206_v1  ;;  %429 = vmatprep.mubr.msk.f32.mxu0 %vm635_vm0, %v636_v4  ;;  %v226_v6 = vld [vmem:[%s846_s2] sm:$0xff]  ;;  %v638_v8 = vmov 0   ;;  %s639_s24 = smov 124   ;;  %vm213_vm1 = vcmask 1031168   ;;  %s418_s21 = sshll.u32 %s623_s15, 7 }
  0x3b   : > { %515 = vset.pattern.permute.xlu1 %v638_v8  ;;  %516 = vset.pattern.permute.xlu0 %v638_v8  ;;  %vm221_vm2 = vcmask 1014784   ;;  %vm223_vm3 = vcmask 1043456   ;;  %vm640_vm4 = vmmov 1   ;;  %v225_v19 = vld [vmem:[%s845_s1] sm:$0xff]  ;;  %vm232_vm6 = vcmask 97280   ;;  %s200_s22 = scalar_lea.vmem [#allocation5], %s413_s7  ;;  %s795_s30 = scalar_lea.hbm %s847_s3, %s418_s21 }
  0x3c   : > { %v505_v5 = vpack.i.bf16 %v206_v1, %v208_v2  ;;  %v510_v7 = vpack.i.bf16 %v216_v3, %v206_v1  ;;  %229 = vperm.xlu1 %515, %v226_v6   ;;  %vm434_vm5 = vmpackc.low %vm223_vm3, %vm640_vm4  ;;  %s324_s23 = sshll.u32 %s200_s22, 4  ;;  %s310_s4 = scalar_lea.sflag [#allocation4], %s773_s5  ;;  %s797_s23 = int_to_ptr.vmem [resolvable:$true] %s324_s23 }
  0x3d   : > { %s549_s11 = scalar_lea.vmem %s797_s23, 128  ;;  %p856_p9 = scmp.ne.s32.totalorder %s851_s25, 0 }
  0x3e   : > { %506 = vrot.lane.b32.xlu0 %v505_v5, %s637_s10  ;;  %p550_p8 = scmp.ne.s32.totalorder %s797_s23, %s549_s11  ;;  %s641_s15 = smov [#allocation5]  }
  0x3f   : > { %s553_s7 = sshll.u32 %s641_s15, 4  ;;  %s554_s7 = int_to_ptr.vmem [resolvable:$false] %s553_s7 }
  0x40   : > { %p551_p11 = pnand %p550_p8, %p856_p9  ;;  %s555_s9 = scalar_lea.vmem %s554_s7, 256 }
  0x41   : > { %p556_p7 = scmp.lt.s32.totalorder %s797_s23, %s554_s7  ;;  %p557_p13 = scmp.lt.s32.totalorder %s555_s9, %s549_s11 }
  0x42   : > { %511 = vrot.lane.b32.xlu0 %v510_v7, %s639_s24  ;;  %p552_p0 = pneg %p551_p11 }
  0x43   : > { %p558_p3 = por %p557_p13, %p556_p7 }
  0x45   : > { %p559_p6 = pnand %p558_p3, %p552_p0 }
  0xb0   : > { %v507_v9 = vpop.permute.xlu0 %506 }
  0xb1   : > { %v509_v10 = vunpack.i.h.bf16 %v507_v9  ;;  %v508_v11 = vunpack.i.l.bf16 %v507_v9 }
  0xb3   : > { %v214_v12 = vsel %vm213_vm1, %v508_v11, %v509_v10 }
  0xb4   : > { %v512_v13 = vpop.permute.xlu0 %511  ;;  %v224_v17 = vsel %vm223_vm3, %v206_v1, %v214_v12 }
  0xb5   : > { %v514_v14 = vunpack.i.h.bf16 %v512_v13  ;;  %v513_v15 = vunpack.i.l.bf16 %v512_v13 }
  0xb7   : > { %v222_v16 = vsel %vm221_vm2, %v513_v15, %v514_v14 }
  0xb8   : > { %v433_v18 = vpack.c.bf16 %v222_v16, %v224_v17 }
  0xba   : > { %435 = vmatpush3.bf16.msk.msra.mxu0 %vm434_vm5, %v433_v18 }
  0xbb   : > { %v230_v20 = vpop.permute.xlu1 %229 }
  0xbd   : > { %430 = vmatmul.mubr.msk.f32.vlgmr.msra.gmra.mrb[0].mxu0 %vm232_vm6, %v225_v19 }
 0x190   : > { %v304_v21 = vpop.f32.mrb[0].mxu0 }
 0x191   : > { %v305_v22 = vadd.f32 %v304_v21, %v230_v20  ;;  %v431_v23 = vpop.f32.mrb[1].mxu0 }
 0x193   : > { %308 = vst [vmem:[%s200_s22] sm:$0xff] %v305_v22 }
 0x194   : > { %562 = shalt.err (!%p559_p6)
}
 0x195   : > { %s563_s5 = scalar_lea.hbm %s795_s30, 128  ;;  %s567_s10 = scalar_lea.hbm %s847_s3, 256 }
 0x196   : > { %p564_p4 = scmp.ne.s32.totalorder %s795_s30, %s563_s5  ;;  %p568_p1 = scmp.lt.u32.totalorder %s795_s30, %s847_s3 }
 0x197   : > { %p569_p2 = scmp.lt.u32.totalorder %s567_s10, %s563_s5  ;;  %p571_p8 = scmp.lt.u32.totalorder %s563_s5, %s795_s30 }
 0x198   : > { %p565_p10 = pnand %p564_p4, %p856_p9 }
 0x199   : > { %p570_p5 = por %p569_p2, %p568_p1 }
 0x19a   : > { %p566_p12 = pneg %p565_p10 }
 0x19b   : > { %p572_p11 = por %p571_p8, %p570_p5 }
 0x19d   : > { %p573_p0 = pnand %p572_p11, %p566_p12 }
 0x19f   : > { %576 = shalt.err (!%p573_p0)
}
 0x1a0   : > { %438 = dma.vmem_to_hbm [thread:$0]  (%p856_p9), %s797_s23, 128, %s795_s30, %s310_s4  }
 0x1a1 PF: > { %s336_s19 = sand.u32 1, %s611_s12   ;;  %p857_p7 = scmp.ne.s32.totalorder %s852_s27, 0 }
 0x1a2   : > { %p858_p13 = scmp.ge.s32.totalorder %s631_s17, 2  ;;  %s337_s21 = scalar_lea.sflag [#allocation4], %s336_s19 }
 0x1a4   : > { %p445_p3 = pnand %p858_p13, %p857_p7 }
 0x1a6   : > { %606 = dma.done.wait (!%p445_p3), %s337_s21, 128  }
 0x1a7   : > { %608 = vsyncadd (!%p445_p3), %s337_s21, 4294967168  ;;  %s19_s17 = sadd.s32 1, %s631_s17   ;;  %s859_s12 = smov %s615_s13 }
 0x1a8   : > { %p16_p6 = scmp.ge.s32.totalorder %s19_s17, 4   ;;  %s860_s13 = smov %s619_s14 }
 0x1a9   : > { %s861_s14 = smov %s718_s26  ;;  %s862_s15 = smov %s627_s16 }
 0x1aa   : > { %s863_s16 = smov %s865_s20  ;;  %18 = sbr.rel (!%p16_p6) target bundleno = 6 (0x6), region = 78 }
 0x1b1   :  { %342 = vsyncpa [#allocation3], 1 }
 0x1b2   :  { %344 = vsyncpa [#allocation3 + $0x1], 1 }
 0x1b3   :  { %345 = vsyncpa [#allocation4], 1 }
 0x1b4   :  { %347 = vsyncpa [#allocation4 + $0x1], 1 }

</bundles_post_ra>
